<compile_context>
chip_gen: v7x
topology: tpu7x:2x2x1
jax: 0.10.0
libtpu: 0.0.40
codegen_flags: <defaults>
</compile_context>

<pallas_src>
import jax
import jax.numpy as jnp
from jax.experimental import pallas as pl
from jax.experimental.pallas import tpu as pltpu

INPUT_SIZE = 6
HIDDEN1 = 512
HIDDEN2 = 256
HIDDEN3 = 128
NUM_CLASSES = 2

TB_MAX = 1024  # max batch tile (multiple of 8)


def _round_up(n, m):
    return ((n + m - 1) // m) * m


def _mlp_kernel(x_ref,
                w1_ref, b1_ref,
                w2_ref, b2_ref,
                w3_ref, b3_ref,
                w4_ref, b4_ref,
                out_ref):
    """Fused 4-layer MLP on one batch tile: (matmul+bias+ReLU) x3 + matmul+bias.

    Weights/biases are VMEM-resident (constant block index across grid steps);
    only the (TB, 6) input tile and (TB, 2) output tile stream through.
    """
    x = x_ref[...]  # f32 input tile

    # fc1 + ReLU.  K=6 is a tiny MXU contraction; its FLOPs are negligible so
    # we deliberately do NOT pad K.
    h1 = jnp.dot(x.astype(jnp.bfloat16), w1_ref[...],
                 preferred_element_type=jnp.float32)
    h1 = jnp.maximum(h1 + b1_ref[...], 0.0)

    # fc2 + ReLU (dominant matmul: 512x256).
    h2 = jnp.dot(h1.astype(jnp.bfloat16), w2_ref[...],
                 preferred_element_type=jnp.float32)
    h2 = jnp.maximum(h2 + b2_ref[...], 0.0)

    # fc3 + ReLU.
    h3 = jnp.dot(h2.astype(jnp.bfloat16), w3_ref[...],
                 preferred_element_type=jnp.float32)
    h3 = jnp.maximum(h3 + b3_ref[...], 0.0)

    # fc4 (logits, no activation). Bias folded into the f32 accumulator before
    # the final cast/store.
    out = jnp.dot(h3.astype(jnp.bfloat16), w4_ref[...],
                  preferred_element_type=jnp.float32)
    out_ref[...] = (out + b4_ref[...]).astype(out_ref.dtype)


@jax.jit
def neural_net_forward(x, params):
    """Runs the fused, batch-tiled MLP Pallas kernel.

    x: (B, 6) float32
    params: dict with w1..w4 stored as (in, out) bfloat16 and b1..b4 as (1, out) f32.
    returns: (B, 2) float32 logits
    """
    B = x.shape[0]
    w1, b1 = params["w1"], params["b1"]
    w2, b2 = params["w2"], params["b2"]
    w3, b3 = params["w3"], params["b3"]
    w4, b4 = params["w4"], params["b4"]

    # Pick a batch tile: multiple of 8, capped at TB_MAX; pad ragged batches.
    tb = min(TB_MAX, _round_up(B, 8))
    pb = _round_up(B, tb)
    if pb != B:
        x = jnp.pad(x, ((0, pb - B), (0, 0)))
    grid = (pb // tb,)

    # Constant block index -> the array is DMA'd once and stays VMEM-resident.
    def resident(a):
        return pl.BlockSpec(a.shape, lambda i: (0,) * a.ndim)

    flops = 2 * pb * (INPUT_SIZE * HIDDEN1 + HIDDEN1 * HIDDEN2
                      + HIDDEN2 * HIDDEN3 + HIDDEN3 * NUM_CLASSES)
    bytes_accessed = (
        int(x.size) * x.dtype.itemsize                     # input read
        + pb * NUM_CLASSES * 4                             # output write
        + sum(int(p.size) * p.dtype.itemsize               # resident params
              for p in (w1, b1, w2, b2, w3, b3, w4, b4))
    )

    out = pl.pallas_call(
        _mlp_kernel,
        out_shape=jax.ShapeDtypeStruct((pb, NUM_CLASSES), jnp.float32),
        grid=grid,
        in_specs=[
            pl.BlockSpec((tb, INPUT_SIZE), lambda i: (i, 0)),
            resident(w1), resident(b1),
            resident(w2), resident(b2),
            resident(w3), resident(b3),
            resident(w4), resident(b4),
        ],
        out_specs=pl.BlockSpec((tb, NUM_CLASSES), lambda i: (i, 0)),
        compiler_params=pltpu.CompilerParams(
            dimension_semantics=("parallel",)),  # megacore sharding on v7x
        cost_estimate=pl.CostEstimate(
            flops=flops, transcendentals=0, bytes_accessed=bytes_accessed),
    )(x, w1, b1, w2, b2, w3, b3, w4, b4)

    return out[:B]


def init_params(key):
    """Deterministic init mimicking PyTorch nn.Linear default
    (uniform(-1/sqrt(fan_in), 1/sqrt(fan_in))).
    Weights stored as (in, out) bfloat16; biases as (1, out) float32."""
    dims = [(INPUT_SIZE, HIDDEN1), (HIDDEN1, HIDDEN2),
            (HIDDEN2, HIDDEN3), (HIDDEN3, NUM_CLASSES)]
    params = {}
    keys = jax.random.split(key, 2 * len(dims))
    for i, (fan_in, fan_out) in enumerate(dims):
        bound = 1.0 / (fan_in ** 0.5)
        w = jax.random.uniform(keys[2 * i], (fan_in, fan_out), jnp.float32,
                               -bound, bound)
        b = jax.random.uniform(keys[2 * i + 1], (1, fan_out), jnp.float32,
                               -bound, bound)
        params[f"w{i + 1}"] = w.astype(jnp.bfloat16)
        params[f"b{i + 1}"] = b
    return params


def _reference_forward(x, params):
    """Pure-JAX reference using the same bf16-weights / f32-accumulate recipe."""
    def dense(h, w, b):
        return jnp.dot(h.astype(jnp.bfloat16), w,
                       preferred_element_type=jnp.float32) + b
    h = jnp.maximum(dense(x, params["w1"], params["b1"]), 0.0)
    h = jnp.maximum(dense(h, params["w2"], params["b2"]), 0.0)
    h = jnp.maximum(dense(h, params["w3"], params["b3"]), 0.0)
    return dense(h, params["w4"], params["b4"])


if __name__ == "__main__":
    key = jax.random.PRNGKey(0)
    k_params, k_x1, k_x2 = jax.random.split(key, 3)
    params = init_params(k_params)

    # Small batch (single tile, matches the module's toy usage).
    x_small = jax.random.normal(k_x1, (8, INPUT_SIZE), jnp.float32)
    out_small = jax.block_until_ready(neural_net_forward(x_small, params))
    ref_small = _reference_forward(x_small, params)
    assert out_small.shape == (8, NUM_CLASSES)
    assert jnp.allclose(out_small, ref_small, atol=2e-2, rtol=2e-2), \
        "small-batch mismatch vs reference"

    # Larger, ragged batch exercising the tiled/pipelined/padded path.
    x_big = jax.random.normal(k_x2, (2050, INPUT_SIZE), jnp.float32)
    out_big = jax.block_until_ready(neural_net_forward(x_big, params))
    ref_big = _reference_forward(x_big, params)
    assert out_big.shape == (2050, NUM_CLASSES)
    assert jnp.allclose(out_big, ref_big, atol=2e-2, rtol=2e-2), \
        "large-batch mismatch vs reference"

    print("KERNEL_OK")
</pallas_src>

<mosaic_0001>
module attributes {stable_mosaic.version = 11 : i64} {
  func.func @_mlp_kernel(%arg0: i32, %arg1: memref<8x6xf32, #tpu.memory_space<vmem>>, %arg2: memref<6x512xbf16, #tpu.memory_space<vmem>>, %arg3: memref<1x512xf32, #tpu.memory_space<vmem>>, %arg4: memref<512x256xbf16, #tpu.memory_space<vmem>>, %arg5: memref<1x256xf32, #tpu.memory_space<vmem>>, %arg6: memref<256x128xbf16, #tpu.memory_space<vmem>>, %arg7: memref<1x128xf32, #tpu.memory_space<vmem>>, %arg8: memref<128x2xbf16, #tpu.memory_space<vmem>>, %arg9: memref<1x2xf32, #tpu.memory_space<vmem>>, %arg10: memref<8x2xf32, #tpu.memory_space<vmem>>) attributes {dimension_semantics = [#tpu.dimension_semantics<parallel>], iteration_bounds = array<i64: 1>, scalar_prefetch = 0 : i64, scratch_operands = 0 : i64, tpu.core_type = #tpu.core_type<tc>, window_params = [{transform_indices = @transform_0, window_bounds = array<i64: 8, 6>}, {pipeline_mode = #tpu.pipeline_mode<synchronous>, transform_indices = @transform_1, window_bounds = array<i64: 6, 512>}, {pipeline_mode = #tpu.pipeline_mode<synchronous>, transform_indices = @transform_2, window_bounds = array<i64: 1, 512>}, {pipeline_mode = #tpu.pipeline_mode<synchronous>, transform_indices = @transform_3, window_bounds = array<i64: 512, 256>}, {pipeline_mode = #tpu.pipeline_mode<synchronous>, transform_indices = @transform_4, window_bounds = array<i64: 1, 256>}, {pipeline_mode = #tpu.pipeline_mode<synchronous>, transform_indices = @transform_5, window_bounds = array<i64: 256, 128>}, {pipeline_mode = #tpu.pipeline_mode<synchronous>, transform_indices = @transform_6, window_bounds = array<i64: 1, 128>}, {pipeline_mode = #tpu.pipeline_mode<synchronous>, transform_indices = @transform_7, window_bounds = array<i64: 128, 2>}, {pipeline_mode = #tpu.pipeline_mode<synchronous>, transform_indices = @transform_8, window_bounds = array<i64: 1, 2>}, {transform_indices = @transform_9, window_bounds = array<i64: 8, 2>}]} {
    %c0 = arith.constant 0 : index
    %c0_0 = arith.constant 0 : index
    %0 = vector.load %arg1[%c0, %c0_0] : memref<8x6xf32, #tpu.memory_space<vmem>>, vector<8x6xf32>
    %1 = arith.truncf %0 : vector<8x6xf32> to vector<8x6xbf16>
    %c0_1 = arith.constant 0 : index
    %c0_2 = arith.constant 0 : index
    %2 = vector.load %arg2[%c0_1, %c0_2] : memref<6x512xbf16, #tpu.memory_space<vmem>>, vector<6x512xbf16>
    %cst = arith.constant dense<0.000000e+00> : vector<8x512xf32>
    %3 = tpu.matmul %1, %2, %cst {dimension_numbers = #tpu.dot_dimension_numbers<[1], [0], [0], [1], [0, 0, 1, 1], [], []>} : vector<8x6xbf16>, vector<6x512xbf16>, vector<8x512xf32> -> vector<8x512xf32>
    %c0_3 = arith.constant 0 : index
    %c0_4 = arith.constant 0 : index
    %4 = vector.load %arg3[%c0_3, %c0_4] : memref<1x512xf32, #tpu.memory_space<vmem>>, vector<1x512xf32>
    %5 = vector.broadcast %4 : vector<1x512xf32> to vector<8x512xf32>
    %6 = arith.addf %3, %5 : vector<8x512xf32>
    %cst_5 = arith.constant 0.000000e+00 : f32
    %7 = vector.broadcast %cst_5 : f32 to vector<8x512xf32>
    %8 = arith.maximumf %6, %7 : vector<8x512xf32>
    %9 = arith.truncf %8 : vector<8x512xf32> to vector<8x512xbf16>
    %c0_6 = arith.constant 0 : index
    %c0_7 = arith.constant 0 : index
    %10 = vector.load %arg4[%c0_6, %c0_7] : memref<512x256xbf16, #tpu.memory_space<vmem>>, vector<512x256xbf16>
    %cst_8 = arith.constant dense<0.000000e+00> : vector<8x256xf32>
    %11 = tpu.matmul %9, %10, %cst_8 {dimension_numbers = #tpu.dot_dimension_numbers<[1], [0], [0], [1], [0, 0, 1, 1], [], []>} : vector<8x512xbf16>, vector<512x256xbf16>, vector<8x256xf32> -> vector<8x256xf32>
    %c0_9 = arith.constant 0 : index
    %c0_10 = arith.constant 0 : index
    %12 = vector.load %arg5[%c0_9, %c0_10] : memref<1x256xf32, #tpu.memory_space<vmem>>, vector<1x256xf32>
    %13 = vector.broadcast %12 : vector<1x256xf32> to vector<8x256xf32>
    %14 = arith.addf %11, %13 : vector<8x256xf32>
    %cst_11 = arith.constant 0.000000e+00 : f32
    %15 = vector.broadcast %cst_11 : f32 to vector<8x256xf32>
    %16 = arith.maximumf %14, %15 : vector<8x256xf32>
    %17 = arith.truncf %16 : vector<8x256xf32> to vector<8x256xbf16>
    %c0_12 = arith.constant 0 : index
    %c0_13 = arith.constant 0 : index
    %18 = vector.load %arg6[%c0_12, %c0_13] : memref<256x128xbf16, #tpu.memory_space<vmem>>, vector<256x128xbf16>
    %cst_14 = arith.constant dense<0.000000e+00> : vector<8x128xf32>
    %19 = tpu.matmul %17, %18, %cst_14 {dimension_numbers = #tpu.dot_dimension_numbers<[1], [0], [0], [1], [0, 0, 1, 1], [], []>} : vector<8x256xbf16>, vector<256x128xbf16>, vector<8x128xf32> -> vector<8x128xf32>
    %c0_15 = arith.constant 0 : index
    %c0_16 = arith.constant 0 : index
    %20 = vector.load %arg7[%c0_15, %c0_16] : memref<1x128xf32, #tpu.memory_space<vmem>>, vector<1x128xf32>
    %21 = vector.broadcast %20 : vector<1x128xf32> to vector<8x128xf32>
    %22 = arith.addf %19, %21 : vector<8x128xf32>
    %cst_17 = arith.constant 0.000000e+00 : f32
    %23 = vector.broadcast %cst_17 : f32 to vector<8x128xf32>
    %24 = arith.maximumf %22, %23 : vector<8x128xf32>
    %25 = arith.truncf %24 : vector<8x128xf32> to vector<8x128xbf16>
    %c0_18 = arith.constant 0 : index
    %c0_19 = arith.constant 0 : index
    %26 = vector.load %arg8[%c0_18, %c0_19] : memref<128x2xbf16, #tpu.memory_space<vmem>>, vector<128x2xbf16>
    %cst_20 = arith.constant dense<0.000000e+00> : vector<8x2xf32>
    %27 = tpu.matmul %25, %26, %cst_20 {dimension_numbers = #tpu.dot_dimension_numbers<[1], [0], [0], [1], [0, 0, 1, 1], [], []>} : vector<8x128xbf16>, vector<128x2xbf16>, vector<8x2xf32> -> vector<8x2xf32>
    %c0_21 = arith.constant 0 : index
    %c0_22 = arith.constant 0 : index
    %28 = vector.load %arg9[%c0_21, %c0_22] : memref<1x2xf32, #tpu.memory_space<vmem>>, vector<1x2xf32>
    %29 = vector.broadcast %28 : vector<1x2xf32> to vector<8x2xf32>
    %30 = arith.addf %27, %29 : vector<8x2xf32>
    %c0_23 = arith.constant 0 : index
    %c0_24 = arith.constant 0 : index
    %31 = vector.load %arg10[%c0_23, %c0_24] : memref<8x2xf32, #tpu.memory_space<vmem>>, vector<8x2xf32>
    tpu.vector_store %arg10[%c0_23, %c0_24], %30 {strides = array<i32>} : memref<8x2xf32, #tpu.memory_space<vmem>>, vector<8x2xf32>,
    return
  }
  func.func @transform_0(%arg0: i32) -> (i32, i32) {
    %c0_i32 = arith.constant 0 : i32
    %c0_i32_0 = arith.constant 0 : i32
    return %arg0, %c0_i32 : i32, i32
  }
  func.func @transform_1(%arg0: i32) -> (i32, i32) {
    %c0_i32 = arith.constant 0 : i32
    %c0_i32_0 = arith.constant 0 : i32
    %c0_i32_1 = arith.constant 0 : i32
    return %c0_i32, %c0_i32_0 : i32, i32
  }
  func.func @transform_2(%arg0: i32) -> (i32, i32) {
    %c0_i32 = arith.constant 0 : i32
    %c0_i32_0 = arith.constant 0 : i32
    %c0_i32_1 = arith.constant 0 : i32
    return %c0_i32, %c0_i32_0 : i32, i32
  }
  func.func @transform_3(%arg0: i32) -> (i32, i32) {
    %c0_i32 = arith.constant 0 : i32
    %c0_i32_0 = arith.constant 0 : i32
    %c0_i32_1 = arith.constant 0 : i32
    return %c0_i32, %c0_i32_0 : i32, i32
  }
  func.func @transform_4(%arg0: i32) -> (i32, i32) {
    %c0_i32 = arith.constant 0 : i32
    %c0_i32_0 = arith.constant 0 : i32
    %c0_i32_1 = arith.constant 0 : i32
    return %c0_i32, %c0_i32_0 : i32, i32
  }
  func.func @transform_5(%arg0: i32) -> (i32, i32) {
    %c0_i32 = arith.constant 0 : i32
    %c0_i32_0 = arith.constant 0 : i32
    %c0_i32_1 = arith.constant 0 : i32
    return %c0_i32, %c0_i32_0 : i32, i32
  }
  func.func @transform_6(%arg0: i32) -> (i32, i32) {
    %c0_i32 = arith.constant 0 : i32
    %c0_i32_0 = arith.constant 0 : i32
    %c0_i32_1 = arith.constant 0 : i32
    return %c0_i32, %c0_i32_0 : i32, i32
  }
  func.func @transform_7(%arg0: i32) -> (i32, i32) {
    %c0_i32 = arith.constant 0 : i32
    %c0_i32_0 = arith.constant 0 : i32
    %c0_i32_1 = arith.constant 0 : i32
    return %c0_i32, %c0_i32_0 : i32, i32
  }
  func.func @transform_8(%arg0: i32) -> (i32, i32) {
    %c0_i32 = arith.constant 0 : i32
    %c0_i32_0 = arith.constant 0 : i32
    %c0_i32_1 = arith.constant 0 : i32
    return %c0_i32, %c0_i32_0 : i32, i32
  }
  func.func @transform_9(%arg0: i32) -> (i32, i32) {
    %c0_i32 = arith.constant 0 : i32
    %c0_i32_0 = arith.constant 0 : i32
    return %arg0, %c0_i32 : i32, i32
  }
}

</mosaic_0001>

<bundles_post_ra>
// kernel: neural_net_forward.1
= control target key start
LH: loop header
LB: loop body
LE: loop exit
PB: predicated region body
PF: predicated region fallthrough
CT: control target
= control target key end

     0   :  { %14 = vsyncpa [#allocation3], 0  ;;  %s1478_s0 = inlined_call_operand.vmem [shape: f32[8,6], index: 0, kind: input, shape index: {}]   ;;  %s1479_s1 = inlined_call_operand.vmem [shape: bf16[6,512], index: 1, kind: input, shape index: {}]   ;;  %s1480_s2 = inlined_call_operand.vmem [shape: f32[1,512], index: 2, kind: input, shape index: {}]   ;;  %s1481_s3 = inlined_call_operand.hbm [shape: bf16[512,256], index: 3, kind: input, shape index: {}]   ;;  %s1482_s4 = inlined_call_operand.vmem [shape: f32[1,256], index: 4, kind: input, shape index: {}]   ;;  %s1483_s5 = inlined_call_operand.hbm [shape: bf16[256,128], index: 5, kind: input, shape index: {}]   ;;  %s1484_s6 = inlined_call_operand.vmem [shape: f32[1,128], index: 6, kind: input, shape index: {}]   ;;  %s1485_s7 = inlined_call_operand.vmem [shape: bf16[128,2], index: 7, kind: input, shape index: {}]   ;;  %s1486_s8 = inlined_call_operand.vmem [shape: f32[1,2], index: 8, kind: input, shape index: {}]   ;;  %s1487_s9 = inlined_call_operand.vmem [shape: f32[8,2], index: 9, kind: output, shape index: {}]  }
   0x1   :  { %15 = vsyncpa [#allocation5], 0  ;;  %s1318_s30 = smov [#allocation2]   ;;  %s1270_s13 = scalar_lea.hbm %s1481_s3, 8192 }
   0x2   :  { %s27_s10 = sshll.u32 %s1318_s30, 4  ;;  %p1271_p0 = scmp.ne.s32.totalorder %s1481_s3, %s1270_s13  ;;  %s28_s10 = int_to_ptr.vmem [resolvable:$true] %s27_s10 }
   0x3   :  { %p1274_p1 = scmp.lt.u32.totalorder %s1270_s13, %s1481_s3 }
   0x5   :  { %p1276_p2 = pnand %p1274_p1, %p1271_p0 }
   0x7   :  { %1279 = shalt.err (!%p1276_p2)
}
   0x8   :  { %s1280_s18 = scalar_lea.vmem %s28_s10, 8192  ;;  %p1285_p4 = scmp.lt.s32.totalorder %s28_s10, %s28_s10 }
   0x9   :  { %p1281_p3 = scmp.ne.s32.totalorder %s28_s10, %s1280_s18  ;;  %p1286_p5 = scmp.lt.s32.totalorder %s1280_s18, %s1280_s18 }
   0xb   :  { %p1287_p6 = por %p1286_p5, %p1285_p4 }
   0xd   :  { %p1288_p7 = pnand %p1287_p6, %p1281_p3 }
   0xf   :  { %1291 = shalt.err (!%p1288_p7)
}
  0x10   :  { %s1319_s19 = smov 128   ;;  %s1320_s20 = smov 8  }
  0x11   :  { %33 = dma.hbm_to_vmem [thread:$0]  %s1481_s3, 8192, %s28_s10, [#allocation3], %s1319_s19, %s1319_s19, %s1320_s20  }
  0x12   :  { %s1321_s23 = smov [#allocation4]   ;;  %s1292_s27 = scalar_lea.hbm %s1483_s5, 2048 }
  0x13   :  { %s41_s24 = sshll.u32 %s1321_s23, 4  ;;  %p1293_p8 = scmp.ne.s32.totalorder %s1483_s5, %s1292_s27  ;;  %s42_s24 = int_to_ptr.vmem [resolvable:$true] %s41_s24 }
  0x14   :  { %p1296_p9 = scmp.lt.u32.totalorder %s1292_s27, %s1483_s5 }
  0x16   :  { %p1298_p10 = pnand %p1296_p9, %p1293_p8 }
  0x18   :  { %1301 = shalt.err (!%p1298_p10)
}
  0x19   :  { %s1302_s12 = scalar_lea.vmem %s42_s24, 2048  ;;  %p1307_p12 = scmp.lt.s32.totalorder %s42_s24, %s42_s24 }
  0x1a   :  { %p1303_p11 = scmp.ne.s32.totalorder %s42_s24, %s1302_s12  ;;  %p1308_p13 = scmp.lt.s32.totalorder %s1302_s12, %s1302_s12 }
  0x1c   :  { %p1309_p0 = por %p1308_p13, %p1307_p12 }
  0x1e   :  { %p1310_p1 = pnand %p1309_p0, %p1303_p11 }
  0x20   :  { %1313 = shalt.err (!%p1310_p1)
}
  0x21   :  { %s1322_s3 = smov 64   ;;  %s1323_s10 = smov 4  }
  0x22   :  { %47 = dma.hbm_to_vmem [thread:$0]  %s1483_s5, 2048, %s42_s24, [#allocation5], %s1322_s3, %s1322_s3, %s1323_s10  }
  0x23   :  { %1314 = dma.done.wait [#allocation3], 8192  }
  0x24   :  { %1315 = vsyncadd [#allocation3], 4294959104 }
  0x25   :  { %1316 = dma.done.wait [#allocation5], 2048  }
  0x26   :  { %1317 = vsyncadd [#allocation5], 4294965248  ;;  %v1324_v0 = vmov 0   ;;  %v63_v1 = vld [vmem:[%s1479_s1] sm:$0x77]  ;;  %vm101_vm0 = vcmask 1042432   ;;  %v67_v56 = vlaneseq }
  0x27   :  { %146 = vmatprep.mubr.bf16.mxu1 %v1324_v0  ;;  %v61_v2 = vld [vmem:[%s1478_s0] sm:$0xff]  ;;  %v64_v3 = vld [vmem:[%s1479_s1 + $0x8] sm:$0x77]  ;;  %v983_v4 = vcombine.high %v63_v1, %v63_v1  ;;  %v982_v5 = vcombine.low %v63_v1, %v63_v1  ;;  %v1153_v12 = vld [vmem:[#allocation2 + $0x14] ss:$8 sps:$4 sm:$0xff]   ;;  %vm97_vm1 = vcmask 48128  }
  0x28   :  { %v985_v6 = vcombine.high %v64_v3, %v64_v3  ;;  %v1150_v7 = vld [vmem:[#allocation2 + $0x4] ss:$8 sps:$4 sm:$0xff]   ;;  %v984_v8 = vcombine.low %v64_v3, %v64_v3  ;;  %v1152_v9 = vld [vmem:[#allocation2] ss:$8 sps:$4 sm:$0xff]   ;;  %v62_v11 = vpack.c.bf16 %v61_v2, %v61_v2  ;;  %v1155_v14 = vld [vmem:[#allocation2 + $0x10] ss:$8 sps:$4 sm:$0xff]  }
  0x29   :  { %986 = vmatprep.subr.msk.bf16.mxu1 %vm101_vm0, %v983_v4  ;;  %v103_v10 = vsel %vm101_vm0, %v982_v5, 0  ;;  %600 = vmatprep.subr.bf16.mxu0 %v1150_v7  ;;  %v1156_v15 = vld [vmem:[#allocation2 + $0x24] ss:$8 sps:$4 sm:$0xff]   ;;  %v1158_v16 = vld [vmem:[#allocation2 + $0x20] ss:$8 sps:$4 sm:$0xff]   ;;  %v1250_v48 = vld [vmem:[#allocation4 + $0x50] sm:$0xff]  }
  0x2a   :  { %115 = vmatpush1.bf16.msra.mxu1 %v103_v10  ;;  %601 = vmatpush1.bf16.msra.mxu0 %v1152_v9  ;;  %v109_v13 = vsel %vm101_vm0, %v984_v8, 0  ;;  %v1159_v17 = vld [vmem:[#allocation2 + $0x34] ss:$8 sps:$4 sm:$0xff]   ;;  %v1161_v18 = vld [vmem:[#allocation2 + $0x30] ss:$8 sps:$4 sm:$0xff]   ;;  %v1246_v44 = vld [vmem:[#allocation4 + $0x40] sm:$0xff]  }
  0x2b   :  { %988 = vmatprep.subr.msk.bf16.mxu1 %vm101_vm0, %v985_v6  ;;  %602 = vmatprep.subr.bf16.mxu0 %v1153_v12  ;;  %v1162_v19 = vld [vmem:[#allocation2 + $0x44] ss:$8 sps:$4 sm:$0xff]   ;;  %v1164_v20 = vld [vmem:[#allocation2 + $0x40] ss:$8 sps:$4 sm:$0xff]   ;;  %v1165_v21 = vld [vmem:[#allocation2 + $0x54] ss:$8 sps:$4 sm:$0xff]  }
  0x2c   :  { %v1167_v22 = vld [vmem:[#allocation2 + $0x50] ss:$8 sps:$4 sm:$0xff]   ;;  %v1168_v23 = vld [vmem:[#allocation2 + $0x64] ss:$8 sps:$4 sm:$0xff]   ;;  %v1170_v24 = vld [vmem:[#allocation2 + $0x60] ss:$8 sps:$4 sm:$0xff]  }
  0x2d   :  { %987 = vmatmul.mubr.msk.bf16.vlgmr.msra.gmra.mrb[0].mxu1 %vm97_vm1, %v62_v11  ;;  %v1171_v25 = vld [vmem:[#allocation2 + $0x74] ss:$8 sps:$4 sm:$0xff]   ;;  %v1173_v26 = vld [vmem:[#allocation2 + $0x70] ss:$8 sps:$4 sm:$0xff]   ;;  %v1174_v27 = vld [vmem:[#allocation2 + $0x84] ss:$8 sps:$4 sm:$0xff]  }
  0x2e   :  { %156 = vmatpush1.bf16.msra.mxu1 %v109_v13  ;;  %187 = vmatprep.mubr.bf16.mxu1 %v1324_v0  ;;  %v1176_v28 = vld [vmem:[#allocation2 + $0x80] ss:$8 sps:$4 sm:$0xff]   ;;  %v1177_v29 = vld [vmem:[#allocation2 + $0x94] ss:$8 sps:$4 sm:$0xff]   ;;  %v1179_v30 = vld [vmem:[#allocation2 + $0x90] ss:$8 sps:$4 sm:$0xff]  }
  0x2f   :  { %603 = vmatpush1.bf16.msra.mxu0 %v1155_v14  ;;  %v1180_v31 = vld [vmem:[#allocation2 + $0xa4] ss:$8 sps:$4 sm:$0xff]   ;;  %v1182_v32 = vld [vmem:[#allocation2 + $0xa0] ss:$8 sps:$4 sm:$0xff]   ;;  %v1183_v33 = vld [vmem:[#allocation2 + $0xb4] ss:$8 sps:$4 sm:$0xff]   ;;  %1080 = vmatprep.subr.bf16.mxu1 %v1246_v44 }
  0x30   :  { %604 = vmatprep.subr.bf16.mxu0 %v1156_v15  ;;  %v1185_v34 = vld [vmem:[#allocation2 + $0xb0] ss:$8 sps:$4 sm:$0xff]   ;;  %v1186_v35 = vld [vmem:[#allocation2 + $0xc4] ss:$8 sps:$4 sm:$0xff]   ;;  %v1188_v36 = vld [vmem:[#allocation2 + $0xc0] ss:$8 sps:$4 sm:$0xff]  }
  0x31   :  { %v1189_v37 = vld [vmem:[#allocation2 + $0xd4] ss:$8 sps:$4 sm:$0xff]   ;;  %v1191_v38 = vld [vmem:[#allocation2 + $0xd0] ss:$8 sps:$4 sm:$0xff]   ;;  %v1192_v39 = vld [vmem:[#allocation2 + $0xe4] ss:$8 sps:$4 sm:$0xff]  }
  0x32   :  { %v1194_v40 = vld [vmem:[#allocation2 + $0xe0] ss:$8 sps:$4 sm:$0xff]   ;;  %v1195_v41 = vld [vmem:[#allocation2 + $0xf4] ss:$8 sps:$4 sm:$0xff]   ;;  %v1197_v42 = vld [vmem:[#allocation2 + $0xf0] ss:$8 sps:$4 sm:$0xff]  }
  0x33   :  { %605 = vmatpush1.bf16.msra.mxu0 %v1158_v16  ;;  %v1200_v43 = vld [vmem:[#allocation2 + $0x104] ss:$8 sps:$4 sm:$0xff]   ;;  %v1251_v49 = vld [vmem:[#allocation4 + $0x10] sm:$0xff]   ;;  %v1252_v50 = vld [vmem:[#allocation4 + $0x58] sm:$0xff]   ;;  %v1416_v57 = vshrl.u32 %v67_v56, 7  ;;  %vm1326_vm2 = vmmov 0  }
  0x34   :  { %606 = vmatprep.subr.bf16.mxu0 %v1159_v17  ;;  %v1247_v45 = vld [vmem:[#allocation4] sm:$0xff]   ;;  %v1248_v46 = vld [vmem:[#allocation4 + $0x48] sm:$0xff]   ;;  %v1253_v51 = vld [vmem:[#allocation4 + $0x18] sm:$0xff]   ;;  %vm974_vm3 = vcmask 15360  }
  0x35   :  { %989 = vmatmul.mubr.msk.bf16.vlgmr.msra.gmra.mrb[4].mxu1 %vm97_vm1, %v62_v11  ;;  %v1249_v47 = vld [vmem:[#allocation4 + $0x8] sm:$0xff]   ;;  %v1254_v52 = vld [vmem:[#allocation4 + $0x60] sm:$0xff]   ;;  %v69_v58 = vsub.s32 0, %v1416_v57  ;;  %v73_v60 = vsub.s32 1, %v1416_v57  ;;  %v81_v4 = vsub.s32 3, %v1416_v57  ;;  %v1260_v56 = vld [vmem:[#allocation4 + $0x78] sm:$0xff]  }
  0x36   :  { %1081 = vmatpush3.bf16.msra.mxu1 %v1247_v45  ;;  %v1255_v53 = vld [vmem:[#allocation4 + $0x20] sm:$0xff]   ;;  %v1256_v54 = vld [vmem:[#allocation4 + $0x68] sm:$0xff]   ;;  %v1203_v12 = vld [vmem:[#allocation2 + $0x114] ss:$8 sps:$4 sm:$0xff]  }
  0x37   :  { %607 = vmatpush1.bf16.msra.mxu0 %v1161_v18  ;;  %1082 = vmatprep.subr.bf16.mxu1 %v1248_v46  ;;  %v1257_v55 = vld [vmem:[#allocation4 + $0x28] sm:$0xff]   ;;  %v1422_v59 = vld [vmem:[%s1480_s2] sm:$0xf]  ;;  %v1201_v15 = vld [vmem:[#allocation2 + $0x110] ss:$8 sps:$4 sm:$0xff]  }
  0x38   :  { %608 = vmatprep.subr.bf16.mxu0 %v1162_v19  ;;  %v70_v61 = vrot.slane %v1422_v59, %v69_v58  ;;  %v74_v62 = vrot.slane %v1422_v59, %v73_v60  ;;  %v1198_v9 = vld [vmem:[#allocation2 + $0x100] ss:$8 sps:$4 sm:$0xff]   ;;  %v82_v10 = vrot.slane %v1422_v59, %v81_v4  ;;  %v1206_v18 = vld [vmem:[#allocation2 + $0x124] ss:$8 sps:$4 sm:$0xff]   ;;  %v1239_v44 = vld [vmem:[#allocation2 + $0x1d4] ss:$8 sps:$4 sm:$0xff]  }
  0x39   :  { %v1237_v45 = vld [vmem:[#allocation2 + $0x1d0] ss:$8 sps:$4 sm:$0xff]  }
  0x3a   :  { %1083 = vmatpush3.bf16.msra.mxu1 %v1249_v47  ;;  %v1242_v47 = vld [vmem:[#allocation2 + $0x1e4] ss:$8 sps:$4 sm:$0xff]  }
  0x3b   :  { %609 = vmatpush1.bf16.msra.mxu0 %v1164_v20  ;;  %1084 = vmatprep.subr.bf16.mxu1 %v1250_v48  ;;  %v1240_v48 = vld [vmem:[#allocation2 + $0x1e0] ss:$8 sps:$4 sm:$0xff]  }
  0x3c   :  { %610 = vmatprep.subr.bf16.mxu0 %v1165_v21  ;;  %v1204_v21 = vld [vmem:[#allocation2 + $0x120] ss:$8 sps:$4 sm:$0xff]  }
  0x3e   :  { %1085 = vmatpush3.bf16.msra.mxu1 %v1251_v49 }
  0x3f   :  { %611 = vmatpush1.bf16.msra.mxu0 %v1167_v22  ;;  %1086 = vmatprep.subr.bf16.mxu1 %v1252_v50  ;;  %v1245_v50 = vld [vmem:[#allocation2 + $0x1f4] ss:$8 sps:$4 sm:$0xff]  }
  0x40   :  { %612 = vmatprep.subr.bf16.mxu0 %v1168_v23  ;;  %v1209_v23 = vld [vmem:[#allocation2 + $0x134] ss:$8 sps:$4 sm:$0xff]  }
  0x42   :  { %1087 = vmatpush3.bf16.msra.mxu1 %v1253_v51  ;;  %v1243_v51 = vld [vmem:[#allocation2 + $0x1f0] ss:$8 sps:$4 sm:$0xff]  }
  0x43   :  { %613 = vmatpush1.bf16.msra.mxu0 %v1170_v24  ;;  %1088 = vmatprep.subr.bf16.mxu1 %v1254_v52  ;;  %v1207_v24 = vld [vmem:[#allocation2 + $0x130] ss:$8 sps:$4 sm:$0xff]  }
  0x44   :  { %614 = vmatprep.subr.bf16.mxu0 %v1171_v25  ;;  %v1212_v25 = vld [vmem:[#allocation2 + $0x144] ss:$8 sps:$4 sm:$0xff]  }
  0x46   :  { %1089 = vmatpush3.bf16.msra.mxu1 %v1255_v53 }
  0x47   :  { %615 = vmatpush1.bf16.msra.mxu0 %v1173_v26  ;;  %1090 = vmatprep.subr.bf16.mxu1 %v1256_v54  ;;  %v1210_v26 = vld [vmem:[#allocation2 + $0x140] ss:$8 sps:$4 sm:$0xff]   ;;  %v1258_v54 = vld [vmem:[#allocation4 + $0x70] sm:$0xff]  }
  0x48   :  { %616 = vmatprep.subr.bf16.mxu0 %v1174_v27  ;;  %v1215_v27 = vld [vmem:[#allocation2 + $0x154] ss:$8 sps:$4 sm:$0xff]  }
  0x4a   :  { %1091 = vmatpush3.bf16.msra.mxu1 %v1257_v55  ;;  %v1259_v55 = vld [vmem:[#allocation4 + $0x30] sm:$0xff]  }
  0x4b   :  { %617 = vmatpush1.bf16.msra.mxu0 %v1176_v28  ;;  %v1213_v28 = vld [vmem:[#allocation2 + $0x150] ss:$8 sps:$4 sm:$0xff]   ;;  %1092 = vmatprep.subr.bf16.mxu1 %v1258_v54 }
  0x4c   :  { %618 = vmatprep.subr.bf16.mxu0 %v1177_v29  ;;  %v1218_v29 = vld [vmem:[#allocation2 + $0x164] ss:$8 sps:$4 sm:$0xff]  }
  0x4e   :  { %1093 = vmatpush3.bf16.msra.mxu1 %v1259_v55 }
  0x4f   :  { %619 = vmatpush1.bf16.msra.mxu0 %v1179_v30  ;;  %v1216_v30 = vld [vmem:[#allocation2 + $0x160] ss:$8 sps:$4 sm:$0xff]   ;;  %1094 = vmatprep.subr.bf16.mxu1 %v1260_v56 }
  0x50   :  { %620 = vmatprep.subr.bf16.mxu0 %v1180_v31  ;;  %v1221_v31 = vld [vmem:[#allocation2 + $0x174] ss:$8 sps:$4 sm:$0xff]  }
  0x53   :  { %621 = vmatpush1.bf16.msra.mxu0 %v1182_v32  ;;  %v1219_v32 = vld [vmem:[#allocation2 + $0x170] ss:$8 sps:$4 sm:$0xff]  }
  0x54   :  { %622 = vmatprep.subr.bf16.mxu0 %v1183_v33  ;;  %v1224_v33 = vld [vmem:[#allocation2 + $0x184] ss:$8 sps:$4 sm:$0xff]  }
  0x57   :  { %623 = vmatpush1.bf16.msra.mxu0 %v1185_v34  ;;  %v1222_v34 = vld [vmem:[#allocation2 + $0x180] ss:$8 sps:$4 sm:$0xff]  }
  0x58   :  { %624 = vmatprep.subr.bf16.mxu0 %v1186_v35  ;;  %v1227_v35 = vld [vmem:[#allocation2 + $0x194] ss:$8 sps:$4 sm:$0xff]  }
  0x5b   :  { %625 = vmatpush1.bf16.msra.mxu0 %v1188_v36  ;;  %v1225_v36 = vld [vmem:[#allocation2 + $0x190] ss:$8 sps:$4 sm:$0xff]  }
  0x5c   :  { %626 = vmatprep.subr.bf16.mxu0 %v1189_v37  ;;  %v1230_v37 = vld [vmem:[#allocation2 + $0x1a4] ss:$8 sps:$4 sm:$0xff]  }
  0x5f   :  { %627 = vmatpush1.bf16.msra.mxu0 %v1191_v38  ;;  %v1228_v38 = vld [vmem:[#allocation2 + $0x1a0] ss:$8 sps:$4 sm:$0xff]  }
  0x60   :  { %628 = vmatprep.subr.bf16.mxu0 %v1192_v39  ;;  %v1233_v39 = vld [vmem:[#allocation2 + $0x1b4] ss:$8 sps:$4 sm:$0xff]  }
  0x63   :  { %629 = vmatpush1.bf16.msra.mxu0 %v1194_v40  ;;  %v1231_v40 = vld [vmem:[#allocation2 + $0x1b0] ss:$8 sps:$4 sm:$0xff]  }
  0x64   :  { %630 = vmatprep.subr.bf16.mxu0 %v1195_v41  ;;  %v1236_v41 = vld [vmem:[#allocation2 + $0x1c4] ss:$8 sps:$4 sm:$0xff]  }
  0x67   :  { %631 = vmatpush1.bf16.msra.mxu0 %v1197_v42  ;;  %v1234_v42 = vld [vmem:[#allocation2 + $0x1c0] ss:$8 sps:$4 sm:$0xff]  }
  0x68   :  { %641 = vmatprep.subr.bf16.mxu0 %v1200_v43  ;;  %v77_v43 = vsub.s32 2, %v1416_v57  ;;  %v1263_v57 = vld [vmem:[%s1485_s7 + $0x8] sm:$0xff]  }
  0x6a   :  { %v78_v46 = vrot.slane %v1422_v59, %v77_v43  ;;  %v1261_v59 = vld [vmem:[#allocation4 + $0x38] sm:$0xff]  }
  0x6b   :  { %1095 = vmatpush3.bf16.msra.mxu1 %v1261_v59 }
 0x100   :  { %v148_v63 = vpop.f32.mrb[0].mxu1 }
 0x101   :  { %v149_v0 = vadd.f32 %v148_v63, %v70_v61  ;;  %v150_v1 = vpop.f32.mrb[1].mxu1  ;;  %v1325_v61 = vmov 0.0  }
 0x102   :  { %v151_v2 = vadd.f32 %v150_v1, %v74_v62  ;;  %v152_v3 = vpop.f32.mrb[2].mxu1  ;;  %1111 = vmatprep.subr.bf16.mxu1 %v1325_v61  ;;  %v268_v62 = vld [vmem:[%s1482_s4] sm:$0x3] }
 0x103   :  { %v196_v5 = vmax.f32 %v149_v0, 0.0  ;;  %v153_v6 = vpop.f32.mrb[3].mxu1  ;;  %v273_v63 = vrot.slane %v268_v62, %v69_v58  ;;  %v277_v0 = vrot.slane %v268_v62, %v73_v60  ;;  %v1264_v58 = vld [vmem:[%s1485_s7 + $0x10] sm:$0xff]   ;;  %v1265_v60 = vld [vmem:[%s1485_s7 + $0x18] sm:$0xff]  }
 0x104   :  { %v197_v7 = vmax.f32 %v151_v2, 0.0 }
 0x105   :  { %v200_v11 = vpack.c.bf16 %v196_v5, %v196_v5 }
 0x106   :  { %v201_v8 = vpack.c.bf16 %v197_v7, %v197_v7 }
 0x108   :  { %632 = vmatprep.mubr.bf16.mxu0 %v201_v8  ;;  %v1433_v13 = vpop.f32.mrb[4].mxu1 }
 0x109   :  { %633 = vmatmul.mubr.bf16.vlgmr.msra.gmra.mrb[0].mxu0 %v200_v11  ;;  %v191_v14 = vpop.f32.mrb[5].mxu1  ;;  %v190_v49 = vadd.f32 %v1433_v13, %v78_v46  ;;  %v1267_v13 = vld [vmem:[%s1485_s7 + $0x28] sm:$0xff]  }
 0x10a   :  { %642 = vmatpush1.bf16.msra.mxu0 %v1198_v9  ;;  %v192_v16 = vadd.f32 %v191_v14, %v82_v10  ;;  %v193_v17 = vpop.f32.mrb[6].mxu1  ;;  %v1262_v10 = vld [vmem:[%s1485_s7] sm:$0xff]   ;;  %v1268_v14 = vld [vmem:[%s1485_s7 + $0x30] sm:$0xff]  }
 0x10b   :  { %643 = vmatprep.subr.bf16.mxu0 %v1203_v12  ;;  %v194_v19 = vpop.f32.mrb[7].mxu1  ;;  %v198_v52 = vmax.f32 %v190_v49, 0.0  ;;  %v1266_v12 = vld [vmem:[%s1485_s7 + $0x20] sm:$0xff]  }
 0x10c   :  { %v199_v20 = vmax.f32 %v192_v16, 0.0  ;;  %v1054_v17 = vld [vmem:[%s1484_s6] ss:$0 sm:$0xff] }
 0x10d   :  { %v202_v53 = vpack.c.bf16 %v198_v52, %v198_v52 }
 0x10e   :  { %644 = vmatpush1.bf16.msra.mxu0 %v1201_v15  ;;  %v203_v22 = vpack.c.bf16 %v199_v20, %v199_v20  ;;  %v1269_v15 = vld [vmem:[%s1485_s7 + $0x38] sm:$0xff]  }
 0x10f   :  { %645 = vmatprep.subr.bf16.mxu0 %v1206_v18 }
 0x110   :  { %673 = vmatprep.mubr.bf16.mxu0 %v203_v22 }
 0x112   :  { %646 = vmatpush1.bf16.msra.mxu0 %v1204_v21 }
 0x113   :  { %647 = vmatprep.subr.bf16.mxu0 %v1209_v23 }
 0x116   :  { %648 = vmatpush1.bf16.msra.mxu0 %v1207_v24 }
 0x117   :  { %649 = vmatprep.subr.bf16.mxu0 %v1212_v25  ;;  %v1071_v25 = vld [vmem:[%s1486_s8] ss:$0 sm:$0xff] }
 0x11a   :  { %650 = vmatpush1.bf16.msra.mxu0 %v1210_v26 }
 0x11b   :  { %651 = vmatprep.subr.bf16.mxu0 %v1215_v27 }
 0x11e   :  { %652 = vmatpush1.bf16.msra.mxu0 %v1213_v28 }
 0x11f   :  { %653 = vmatprep.subr.bf16.mxu0 %v1218_v29 }
 0x122   :  { %654 = vmatpush1.bf16.msra.mxu0 %v1216_v30 }
 0x123   :  { %655 = vmatprep.subr.bf16.mxu0 %v1221_v31 }
 0x126   :  { %656 = vmatpush1.bf16.msra.mxu0 %v1219_v32 }
 0x127   :  { %657 = vmatprep.subr.bf16.mxu0 %v1224_v33 }
 0x12a   :  { %658 = vmatpush1.bf16.msra.mxu0 %v1222_v34 }
 0x12b   :  { %659 = vmatprep.subr.bf16.mxu0 %v1227_v35 }
 0x12e   :  { %660 = vmatpush1.bf16.msra.mxu0 %v1225_v36 }
 0x12f   :  { %661 = vmatprep.subr.bf16.mxu0 %v1230_v37 }
 0x132   :  { %662 = vmatpush1.bf16.msra.mxu0 %v1228_v38 }
 0x133   :  { %663 = vmatprep.subr.bf16.mxu0 %v1233_v39 }
 0x136   :  { %664 = vmatpush1.bf16.msra.mxu0 %v1231_v40 }
 0x137   :  { %665 = vmatprep.subr.bf16.mxu0 %v1236_v41 }
 0x13a   :  { %666 = vmatpush1.bf16.msra.mxu0 %v1234_v42 }
 0x13b   :  { %667 = vmatprep.subr.bf16.mxu0 %v1239_v44 }
 0x13e   :  { %668 = vmatpush1.bf16.msra.mxu0 %v1237_v45 }
 0x13f   :  { %669 = vmatprep.subr.bf16.mxu0 %v1242_v47 }
 0x142   :  { %670 = vmatpush1.bf16.msra.mxu0 %v1240_v48 }
 0x143   :  { %671 = vmatprep.subr.bf16.mxu0 %v1245_v50 }
 0x146   :  { %672 = vmatpush1.bf16.msra.mxu0 %v1243_v51 }
 0x149   :  { %674 = vmatmul.mubr.bf16.vlgmr.msra.gmra.mrb[0].mxu0 %v202_v53 }
 0x21c   :  { %v675_v1 = vpop.f32.mrb[0].mxu0 }
 0x21d   :  { %v1131_v2 = vadd.f32 %v675_v1, %v273_v63  ;;  %v677_v3 = vpop.f32.mrb[1].mxu0 }
 0x21e   :  { %v1132_v4 = vadd.f32 %v677_v3, %v277_v0  ;;  %v679_v5 = vpop.f32.mrb[2].mxu0 }
 0x21f   :  { %v682_v6 = vmax.f32 %v1131_v2, 0.0  ;;  %v680_v7 = vpop.f32.mrb[3].mxu0 }
 0x220   :  { %v683_v8 = vmax.f32 %v1132_v4, 0.0 }
 0x221   :  { %v684_v11 = vpack.c.bf16 %v682_v6, %v682_v6 }
 0x222   :  { %v685_v9 = vpack.c.bf16 %v683_v8, %v683_v8 }
 0x224   :  { %853 = vmatprep.mubr.bf16.mxu1 %v685_v9 }
 0x225   :  { %854 = vmatmul.mubr.bf16.vlgmr.msra.gmra.mrb[8].mxu1 %v684_v11 }
 0x226   :  { %1112 = vmatpush3.bf16.msra.mxu1 %v1262_v10  ;;  %1127 = vmatprep.mubr.msk.bf16.mxu1 %vm1326_vm2, %v1325_v61 }
 0x227   :  { %1113 = vmatprep.subr.bf16.mxu1 %v1325_v61 }
 0x22a   :  { %1114 = vmatpush3.bf16.msra.mxu1 %v1263_v57 }
 0x22b   :  { %1115 = vmatprep.subr.bf16.mxu1 %v1325_v61 }
 0x22e   :  { %1116 = vmatpush3.bf16.msra.mxu1 %v1264_v58 }
 0x22f   :  { %1117 = vmatprep.subr.bf16.mxu1 %v1325_v61 }
 0x232   :  { %1118 = vmatpush3.bf16.msra.mxu1 %v1265_v60 }
 0x233   :  { %1119 = vmatprep.subr.bf16.mxu1 %v1325_v61 }
 0x236   :  { %1120 = vmatpush3.bf16.msra.mxu1 %v1266_v12 }
 0x237   :  { %1121 = vmatprep.subr.bf16.mxu1 %v1325_v61 }
 0x23a   :  { %1122 = vmatpush3.bf16.msra.mxu1 %v1267_v13 }
 0x23b   :  { %1123 = vmatprep.subr.bf16.mxu1 %v1325_v61 }
 0x23e   :  { %1124 = vmatpush3.bf16.msra.mxu1 %v1268_v14 }
 0x23f   :  { %1125 = vmatprep.subr.bf16.mxu1 %v1325_v61 }
 0x242   :  { %1126 = vmatpush3.bf16.msra.mxu1 %v1269_v15 }
 0x2f8   :  { %v1096_v16 = vpop.f32.mrb[8].mxu1 }
 0x2f9   :  { %v1097_v18 = vpop.f32.mrb[9].mxu1 }
 0x2fa   :  { %v1098_v19 = vadd.f32 %v1097_v18, %v1096_v16  ;;  %v1099_v20 = vpop.f32.mrb[10].mxu1 }
 0x2fb   :  { %v1100_v21 = vpop.f32.mrb[11].mxu1 }
 0x2fc   :  { %v856_v22 = vadd.f32 %v1098_v19, %v1054_v17 }
 0x2fe   :  { %v861_v23 = vmax.f32 %v856_v22, 0.0 }
 0x300   :  { %v862_v24 = vpack.c.bf16 %v861_v23, %v861_v23 }
 0x302   :  { %1128 = vmatmul.mubr.bf16.vlgmr.msra.gmra.mrb[12].mxu1 %v862_v24 }
 0x3d5   :  { %v968_v26 = vpop.f32.mrb[12].mxu1 }
 0x3d6   :  { %v969_v27 = vadd.f32 %v1071_v25, %v968_v26  ;;  %v1129_v28 = vpop.f32.mrb[13].mxu1 }
 0x3d7   :  { %v971_v29 = vpop.f32.mrb[14].mxu1 }
 0x3d8   :  { %975 = vst.msk [vmem:[%s1487_s9] sm:$0xff] %vm974_vm3, %v969_v27  ;;  %v1130_v30 = vpop.f32.mrb[15].mxu1 }
 0x3d9   :  { %980 = vsyncpa [#allocation3], 1 }
 0x3da   :  { %981 = vsyncpa [#allocation5], 1 }

</bundles_post_ra>
